<compile_context>
chip_gen: v7x
topology: tpu7x:2x2x1
jax: 0.10.0
libtpu: 0.0.40
codegen_flags: <defaults>
</compile_context>

<pallas_src>
import functools

import jax
import jax.numpy as jnp
from jax.experimental import pallas as pl
from jax.experimental.pallas import tpu as pltpu


def _round_up(x, m):
    return (x + m - 1) // m * m


def _feat_align(d):
    # 256-align large feature dims so M/N/K land on the 256x256 MXU tile
    # (v6e/v7x); small dims stay 128-aligned to bound padding waste.
    return 256 if d >= 512 else 128


def _batch_granule(dtype):
    # Sublane packing granule: 8 rows for 4-byte dtypes, 16 for bf16, 32 for
    # 1-byte dtypes.
    return 8 * max(1, 4 // jnp.dtype(dtype).itemsize)


def _vmem_cap_bytes():
    """Usable VMEM budget for this kernel (leave headroom for the compiler)."""
    try:
        cap = int(pltpu.get_tpu_info().vmem_capacity_bytes)
    except Exception:
        cap = 64 * 1024 * 1024  # conservative fallback: v7x per-TC VMEM
    return min(int(cap * 0.8), 100 * 1024 * 1024)


def _est_vmem_bytes(tb, tk, fout_p, in_isz, w_isz, out_isz):
    return (2 * tb * tk * in_isz             # x tiles (double buffered)
            + 2 * tk * fout_p * w_isz        # W tiles (double buffered)
            + 3 * fout_p * 4                 # bias/gamma/beta (single buffered)
            + 2 * tb * fout_p * out_isz      # output tiles (double buffered)
            + 2 * tb * fout_p * 4)           # f32 accumulator + epilogue temp


def _pick_batch_tile(bg, granule, max_tile=512):
    if bg <= max_tile:
        tb = bg
    else:
        best = None
        for cand in (512, 448, 384, 320, 256, 192, 128):
            pad = _round_up(bg, cand) - bg
            key = (pad, -cand)            # minimize padding, prefer bigger tile
            if best is None or key < best[0]:
                best = (key, cand)
        tb = best[1]
    # v7x has 2 TensorCores: give the "parallel" batch axis >= 2 steps when
    # there is enough work so both cores get a tile.
    if bg // tb < 2 and bg >= 2 * granule:
        tb = _round_up((bg + 1) // 2, granule)
    return tb


def _pick_tiles(tb, granule, fin_p, fout_p, in_isz, w_isz, out_isz, cap):
    # K tile must evenly divide Fin_p (Fin_p is a multiple of 128, so 128
    # always qualifies); pick the largest one that fits the VMEM budget.
    k_cands = [c for c in (512, 384, 256, 128) if c <= fin_p and fin_p % c == 0]
    tk = k_cands[-1]
    for c in k_cands:
        if _est_vmem_bytes(tb, c, fout_p, in_isz, w_isz, out_isz) <= cap:
            tk = c
            break
    # If even the smallest K tile does not fit, shrink the batch tile.
    while (_est_vmem_bytes(tb, tk, fout_p, in_isz, w_isz, out_isz) > cap
           and tb > granule):
        tb = max(granule, _round_up(tb // 2, granule))
    return tb, tk


def _const_spec(block_shape, index_map):
    """Single-buffer a constant-index operand (its block index never changes)."""
    try:
        return pl.BlockSpec(block_shape, index_map,
                            pipeline_mode=pl.Buffered(1))
    except TypeError:   # very old jax without pipeline_mode: default buffering
        return pl.BlockSpec(block_shape, index_map)


def _mlp_block_kernel(seed_ref, x_ref, w_ref, b_ref, g_ref, beta_ref, o_ref,
                      acc_ref, *, p, training, eps, n_features, mxu_dtype):
    k = pl.program_id(1)

    @pl.when(k == 0)
    def _():
        acc_ref[...] = jnp.zeros_like(acc_ref)

    xk = x_ref[...]
    wk = w_ref[...]
    if mxu_dtype is not None:
        # Numerics tradeoff: bf16 MXU operands (~3x faster than f32 emulation);
        # accumulation and the whole epilogue stay f32.
        xk = xk.astype(mxu_dtype)
        wk = wk.astype(mxu_dtype)
    acc_ref[...] += jnp.dot(xk, wk, preferred_element_type=jnp.float32)

    @pl.when(k == pl.num_programs(1) - 1)
    def _():
        # Bias + ReLU.
        y = jnp.maximum(acc_ref[...] + b_ref[...], 0.0)

        # Fused single-pass LayerNorm over the true feature width.  Padded
        # output columns are exactly zero (zero W columns / bias / gamma /
        # beta), so they do not perturb the sums; divide by the true width.
        inv_n = jnp.float32(1.0 / n_features)
        s = jnp.sum(y, axis=-1, keepdims=True)
        sq = jnp.sum(y * y, axis=-1, keepdims=True)
        mean = s * inv_n
        var = jnp.maximum(sq * inv_n - mean * mean, 0.0)   # cancellation guard
        y = (y - mean) * jax.lax.rsqrt(var + jnp.float32(eps))
        y = y * g_ref[...] + beta_ref[...]

        # Inverted dropout (training mode only).  The 1/(1-p) rescale is folded
        # into gamma/beta by the wrapper, so only a select remains here.
        if training and p > 0.0:
            tile = pl.program_id(0)
            pltpu.prng_seed(seed_ref[0] ^ (tile * jnp.int32(0x61C88647)
                                           + jnp.int32(0x7ED55D16)))
            bits = pltpu.bitcast(pltpu.prng_random_bits(y.shape), jnp.uint32)
            thresh = jnp.uint32(min(int(p * 4294967296.0), 4294967295))
            y = jnp.where(bits >= thresh, y, 0.0)

        o_ref[...] = y.astype(o_ref.dtype)


def prepare_mlp_params(w, b=None, gamma=None, beta=None, *, p=0.3,
                       training=False, eps=1e-5):
    """Pad / fold the MLPBlock parameters once, outside the per-step hot path."""
    fin, fout = w.shape
    fin_p = _round_up(fin, _feat_align(fin))
    fout_p = _round_up(fout, _feat_align(fout))

    b = jnp.zeros((fout,), jnp.float32) if b is None else b
    gamma = jnp.ones((fout,), jnp.float32) if gamma is None else gamma
    beta = jnp.zeros((fout,), jnp.float32) if beta is None else beta
    b = jnp.asarray(b, jnp.float32).reshape(1, fout)
    gamma = jnp.asarray(gamma, jnp.float32).reshape(1, fout)
    beta = jnp.asarray(beta, jnp.float32).reshape(1, fout)

    # Fold the inverted-dropout rescale into gamma/beta (kernel keeps a select).
    if training and p > 0.0:
        scale = jnp.float32(1.0 / (1.0 - p))
        gamma = gamma * scale
        beta = beta * scale

    if (fin_p, fout_p) != (fin, fout):
        wp = jnp.zeros((fin_p, fout_p), w.dtype).at[:fin, :fout].set(w)
    else:
        wp = w

    def _pad_row(v):
        if fout_p != fout:
            return jnp.zeros((1, fout_p), v.dtype).at[:, :fout].set(v)
        return v

    return dict(w=wp, b=_pad_row(b), gamma=_pad_row(gamma), beta=_pad_row(beta),
                in_features=fin, out_features=fout,
                p=float(p), training=bool(training), eps=float(eps))


def mlp_block_apply(x, params, seed=None, *, mxu_bf16=True, max_batch_tile=512):
    """Fused MLPBlock forward: Linear -> ReLU -> LayerNorm -> Dropout."""
    w, b = params["w"], params["b"]
    gamma, beta = params["gamma"], params["beta"]
    fin, fout = params["in_features"], params["out_features"]
    p, training, eps = params["p"], params["training"], params["eps"]
    fin_p, fout_p = w.shape

    B, fin_x = x.shape
    assert fin_x == fin

    if seed is None:
        seed = jnp.zeros((1,), jnp.int32)

    in_isz = jnp.dtype(x.dtype).itemsize
    w_isz = jnp.dtype(w.dtype).itemsize
    out_isz = in_isz

    granule = _batch_granule(x.dtype)
    bg = _round_up(B, granule)
    cap = _vmem_cap_bytes()
    tb = _pick_batch_tile(bg, granule, max_batch_tile)
    tb, tk = _pick_tiles(tb, granule, fin_p, fout_p, in_isz, w_isz, out_isz, cap)
    bp = _round_up(bg, tb)
    grid_b, grid_k = bp // tb, fin_p // tk

    # Only pad x when actually unaligned (avoid an extra HBM round-trip).
    if bp != B or fin_p != fin:
        xp = jnp.zeros((bp, fin_p), x.dtype).at[:B, :fin].set(x)
    else:
        xp = x

    mxu_dtype = None
    if mxu_bf16 and xp.dtype == jnp.float32 and w.dtype == jnp.float32:
        mxu_dtype = jnp.bfloat16

    kernel = functools.partial(_mlp_block_kernel, p=p, training=training,
                               eps=eps, n_features=fout, mxu_dtype=mxu_dtype)

    est = _est_vmem_bytes(tb, tk, fout_p, in_isz, w_isz, out_isz)
    vmem_limit = min(cap, max(int(est * 1.5) + (4 << 20), 16 << 20))

    cost = pl.CostEstimate(
        flops=2 * bp * fin_p * fout_p,
        transcendentals=bp,                                   # rsqrt per row
        bytes_accessed=(bp * fin_p * in_isz                   # x read once
                        + grid_b * fin_p * fout_p * w_isz     # W streamed per batch tile
                        + bp * fout_p * out_isz               # output
                        + 3 * fout_p * 4),                    # bias/gamma/beta
    )

    out_p = pl.pallas_call(
        kernel,
        out_shape=jax.ShapeDtypeStruct((bp, fout_p), x.dtype),
        grid_spec=pltpu.PrefetchScalarGridSpec(
            num_scalar_prefetch=1,                            # seed -> SMEM
            grid=(grid_b, grid_k),
            in_specs=[
                pl.BlockSpec((tb, tk), lambda i, k, *_: (i, k)),       # x tile
                pl.BlockSpec((tk, fout_p), lambda i, k, *_: (k, 0)),   # W (streamed over K)
                _const_spec((1, fout_p), lambda i, k, *_: (0, 0)),     # bias
                _const_spec((1, fout_p), lambda i, k, *_: (0, 0)),     # gamma
                _const_spec((1, fout_p), lambda i, k, *_: (0, 0)),     # beta
            ],
            out_specs=pl.BlockSpec((tb, fout_p), lambda i, k, *_: (i, 0)),
            scratch_shapes=[pltpu.VMEM((tb, fout_p), jnp.float32)],    # f32 acc
        ),
        compiler_params=pltpu.CompilerParams(
            dimension_semantics=("parallel", "arbitrary"),
            vmem_limit_bytes=int(vmem_limit),
        ),
        cost_estimate=cost,
    )(seed, xp, w, b, gamma, beta)

    if bp != B or fout_p != fout:
        return out_p[:B, :fout]
    return out_p


def mlp_block(x, w, b=None, gamma=None, beta=None, seed=None, *, p=0.3,
              training=False, eps=1e-5, mxu_bf16=True):
    """One-off convenience wrapper (prepare + apply).  Prefer preparing once."""
    params = prepare_mlp_params(w, b, gamma, beta, p=p, training=training,
                                eps=eps)
    return mlp_block_apply(x, params, seed, mxu_bf16=mxu_bf16)


def mlp_block_ref(x, w, b, gamma, beta, eps=1e-5):
    """Pure-JAX reference (eval mode: dropout is identity, as in PyTorch)."""
    y = jnp.maximum(x @ w + b, 0.0)
    mean = jnp.mean(y, axis=-1, keepdims=True)
    var = jnp.mean((y - mean) ** 2, axis=-1, keepdims=True)
    return (y - mean) / jnp.sqrt(var + eps) * gamma + beta


if __name__ == "__main__":
    B, IN_F, OUT_F = 8, 32, 64

    key = jax.random.PRNGKey(0)
    kx, kw, kb = jax.random.split(key, 3)

    x = jax.random.normal(kx, (B, IN_F), dtype=jnp.float32)

    # Deterministic parameter init (mimics nn.Linear uniform(-1/sqrt(fan_in),..))
    bound = 1.0 / (IN_F ** 0.5)
    w = jax.random.uniform(kw, (IN_F, OUT_F), jnp.float32, -bound, bound)
    b = jax.random.uniform(kb, (1, OUT_F), jnp.float32, -bound, bound)
    gamma = jnp.ones((1, OUT_F), jnp.float32)   # nn.LayerNorm weight init
    beta = jnp.zeros((1, OUT_F), jnp.float32)   # nn.LayerNorm bias init

    ref = mlp_block_ref(x, w, b, gamma, beta)

    # Parameters are padded / folded once, outside the per-step hot path.
    params = prepare_mlp_params(w, b, gamma, beta, p=0.3, training=False)

    # Eval-mode forward (dropout = identity, as nn.Dropout.eval()):
    # 1) exact f32 MXU path, tight tolerance.
    out_f32 = jax.block_until_ready(mlp_block_apply(x, params, mxu_bf16=False))
    assert jnp.allclose(out_f32, ref, atol=1e-4, rtol=1e-4), "f32 mismatch"

    # 2) default fast path: bf16 MXU operands, f32 accumulate + f32 LayerNorm.
    out_bf16 = jax.block_until_ready(mlp_block_apply(x, params, mxu_bf16=True))
    assert jnp.allclose(out_bf16, ref, atol=5e-2, rtol=5e-2), "bf16 mismatch"

    # NOTE: training-mode dropout uses the TPU hardware PRNG (pltpu.prng_seed);
    # masks are statistically correct but not bit-identical to torch's RNG, so
    # the deterministic demo exercises eval mode only.
    print("KERNEL_OK")
</pallas_src>

<mosaic_0001>
module attributes {stable_mosaic.version = 11 : i64} {
  func.func @_mlp_block_kernel(%arg0: i32, %arg1: i32, %arg2: memref<1xi32, #tpu.memory_space<smem>>, %arg3: memref<8x128xf32, #tpu.memory_space<vmem>>, %arg4: memref<128x128xf32, #tpu.memory_space<vmem>>, %arg5: memref<1x128xf32, #tpu.memory_space<vmem>>, %arg6: memref<1x128xf32, #tpu.memory_space<vmem>>, %arg7: memref<1x128xf32, #tpu.memory_space<vmem>>, %arg8: memref<8x128xf32, #tpu.memory_space<vmem>>, %arg9: memref<8x128xf32, #tpu.memory_space<vmem>>) attributes {dimension_semantics = [#tpu.dimension_semantics<parallel>, #tpu.dimension_semantics<arbitrary>], iteration_bounds = array<i64: 1, 1>, scalar_prefetch = 1 : i64, scratch_operands = 1 : i64, tpu.core_type = #tpu.core_type<tc>, window_params = [{transform_indices = @transform_0, window_bounds = array<i64: 8, 128>}, {transform_indices = @transform_1, window_bounds = array<i64: 128, 128>}, {pipeline_mode = #tpu.pipeline_mode<synchronous>, transform_indices = @transform_2, window_bounds = array<i64: 1, 128>}, {pipeline_mode = #tpu.pipeline_mode<synchronous>, transform_indices = @transform_3, window_bounds = array<i64: 1, 128>}, {pipeline_mode = #tpu.pipeline_mode<synchronous>, transform_indices = @transform_4, window_bounds = array<i64: 1, 128>}, {transform_indices = @transform_5, window_bounds = array<i64: 8, 128>}]} {
    %c0_i32 = arith.constant 0 : i32
    %0 = arith.cmpi eq, %arg1, %c0_i32 : i32
    %1 = arith.extui %0 : i1 to i32
    %c0_i32_0 = arith.constant 0 : i32
    %2 = arith.cmpi ne, %1, %c0_i32_0 : i32
    scf.if %2 {
      %cst_10 = arith.constant 0.000000e+00 : f32
      %12 = vector.broadcast %cst_10 : f32 to vector<8x128xf32>
      %c0_11 = arith.constant 0 : index
      %c0_12 = arith.constant 0 : index
      %13 = vector.load %arg9[%c0_11, %c0_12] : memref<8x128xf32, #tpu.memory_space<vmem>>, vector<8x128xf32>
      tpu.vector_store %arg9[%c0_11, %c0_12], %12 {strides = array<i32>} : memref<8x128xf32, #tpu.memory_space<vmem>>, vector<8x128xf32>,
    } else {
    }
    %c0 = arith.constant 0 : index
    %c0_1 = arith.constant 0 : index
    %3 = vector.load %arg3[%c0, %c0_1] : memref<8x128xf32, #tpu.memory_space<vmem>>, vector<8x128xf32>
    %c0_2 = arith.constant 0 : index
    %c0_3 = arith.constant 0 : index
    %4 = vector.load %arg4[%c0_2, %c0_3] : memref<128x128xf32, #tpu.memory_space<vmem>>, vector<128x128xf32>
    %c0_4 = arith.constant 0 : index
    %c0_5 = arith.constant 0 : index
    %5 = vector.load %arg9[%c0_4, %c0_5] : memref<8x128xf32, #tpu.memory_space<vmem>>, vector<8x128xf32>
    %cst = arith.constant dense<0.000000e+00> : vector<8x128xf32>
    %6 = tpu.matmul %3, %4, %cst {dimension_numbers = #tpu.dot_dimension_numbers<[1], [0], [0], [1], [0, 0, 1, 1], [], []>} : vector<8x128xf32>, vector<128x128xf32>, vector<8x128xf32> -> vector<8x128xf32>
    %7 = arith.addf %5, %6 : vector<8x128xf32>
    %c0_6 = arith.constant 0 : index
    %c0_7 = arith.constant 0 : index
    %8 = vector.load %arg9[%c0_6, %c0_7] : memref<8x128xf32, #tpu.memory_space<vmem>>, vector<8x128xf32>
    tpu.vector_store %arg9[%c0_6, %c0_7], %7 {strides = array<i32>} : memref<8x128xf32, #tpu.memory_space<vmem>>, vector<8x128xf32>,
    %c0_i32_8 = arith.constant 0 : i32
    %9 = arith.cmpi eq, %arg1, %c0_i32_8 : i32
    %10 = arith.extui %9 : i1 to i32
    %c0_i32_9 = arith.constant 0 : i32
    %11 = arith.cmpi ne, %10, %c0_i32_9 : i32
    scf.if %11 {
      %c0_10 = arith.constant 0 : index
      %c0_11 = arith.constant 0 : index
      %12 = vector.load %arg9[%c0_10, %c0_11] : memref<8x128xf32, #tpu.memory_space<vmem>>, vector<8x128xf32>
      %c0_12 = arith.constant 0 : index
      %c0_13 = arith.constant 0 : index
      %13 = vector.load %arg5[%c0_12, %c0_13] : memref<1x128xf32, #tpu.memory_space<vmem>>, vector<1x128xf32>
      %14 = vector.broadcast %13 : vector<1x128xf32> to vector<8x128xf32>
      %15 = arith.addf %12, %14 : vector<8x128xf32>
      %cst_14 = arith.constant 0.000000e+00 : f32
      %16 = vector.broadcast %cst_14 : f32 to vector<8x128xf32>
      %17 = arith.maximumf %15, %16 : vector<8x128xf32>
      %cst_15 = arith.constant dense<0.000000e+00> : vector<8xf32>
      %18 = vector.multi_reduction <add>, %17, %cst_15 [1] : vector<8x128xf32> to vector<8xf32>
      %19 = vector.shape_cast %18 : vector<8xf32> to vector<8x1xf32>
      %20 = arith.mulf %17, %17 : vector<8x128xf32>
      %cst_16 = arith.constant dense<0.000000e+00> : vector<8xf32>
      %21 = vector.multi_reduction <add>, %20, %cst_16 [1] : vector<8x128xf32> to vector<8xf32>
      %22 = vector.shape_cast %21 : vector<8xf32> to vector<8x1xf32>
      %cst_17 = arith.constant 1.562500e-02 : f32
      %23 = vector.broadcast %cst_17 : f32 to vector<8x1xf32>
      %24 = arith.mulf %19, %23 : vector<8x1xf32>
      %cst_18 = arith.constant 1.562500e-02 : f32
      %25 = vector.broadcast %cst_18 : f32 to vector<8x1xf32>
      %26 = arith.mulf %22, %25 : vector<8x1xf32>
      %27 = arith.mulf %24, %24 : vector<8x1xf32>
      %28 = arith.subf %26, %27 : vector<8x1xf32>
      %cst_19 = arith.constant 0.000000e+00 : f32
      %29 = vector.broadcast %cst_19 : f32 to vector<8x1xf32>
      %30 = arith.maximumf %28, %29 : vector<8x1xf32>
      %31 = vector.broadcast %24 : vector<8x1xf32> to vector<8x128xf32>
      %32 = arith.subf %17, %31 : vector<8x128xf32>
      %cst_20 = arith.constant 9.99999974E-6 : f32
      %33 = vector.broadcast %cst_20 : f32 to vector<8x1xf32>
      %34 = arith.addf %30, %33 : vector<8x1xf32>
      %35 = math.rsqrt %34 : vector<8x1xf32>
      %36 = vector.broadcast %35 : vector<8x1xf32> to vector<8x128xf32>
      %37 = arith.mulf %32, %36 : vector<8x128xf32>
      %c0_21 = arith.constant 0 : index
      %c0_22 = arith.constant 0 : index
      %38 = vector.load %arg6[%c0_21, %c0_22] : memref<1x128xf32, #tpu.memory_space<vmem>>, vector<1x128xf32>
      %39 = vector.broadcast %38 : vector<1x128xf32> to vector<8x128xf32>
      %40 = arith.mulf %37, %39 : vector<8x128xf32>
      %c0_23 = arith.constant 0 : index
      %c0_24 = arith.constant 0 : index
      %41 = vector.load %arg7[%c0_23, %c0_24] : memref<1x128xf32, #tpu.memory_space<vmem>>, vector<1x128xf32>
      %42 = vector.broadcast %41 : vector<1x128xf32> to vector<8x128xf32>
      %43 = arith.addf %40, %42 : vector<8x128xf32>
      %c0_25 = arith.constant 0 : index
      %c0_26 = arith.constant 0 : index
      %44 = vector.load %arg8[%c0_25, %c0_26] : memref<8x128xf32, #tpu.memory_space<vmem>>, vector<8x128xf32>
      tpu.vector_store %arg8[%c0_25, %c0_26], %43 {strides = array<i32>} : memref<8x128xf32, #tpu.memory_space<vmem>>, vector<8x128xf32>,
    } else {
    }
    return
  }
  func.func @transform_0(%arg0: i32, %arg1: i32, %arg2: memref<1xi32, #tpu.memory_space<smem>>) -> (i32, i32) {
    %c0_i32 = arith.constant 0 : i32
    return %arg0, %arg1 : i32, i32
  }
  func.func @transform_1(%arg0: i32, %arg1: i32, %arg2: memref<1xi32, #tpu.memory_space<smem>>) -> (i32, i32) {
    %c0_i32 = arith.constant 0 : i32
    %c0_i32_0 = arith.constant 0 : i32
    return %arg1, %c0_i32 : i32, i32
  }
  func.func @transform_2(%arg0: i32, %arg1: i32, %arg2: memref<1xi32, #tpu.memory_space<smem>>) -> (i32, i32) {
    %c0_i32 = arith.constant 0 : i32
    %c0_i32_0 = arith.constant 0 : i32
    %c0_i32_1 = arith.constant 0 : i32
    return %c0_i32, %c0_i32_0 : i32, i32
  }
  func.func @transform_3(%arg0: i32, %arg1: i32, %arg2: memref<1xi32, #tpu.memory_space<smem>>) -> (i32, i32) {
    %c0_i32 = arith.constant 0 : i32
    %c0_i32_0 = arith.constant 0 : i32
    %c0_i32_1 = arith.constant 0 : i32
    return %c0_i32, %c0_i32_0 : i32, i32
  }
  func.func @transform_4(%arg0: i32, %arg1: i32, %arg2: memref<1xi32, #tpu.memory_space<smem>>) -> (i32, i32) {
    %c0_i32 = arith.constant 0 : i32
    %c0_i32_0 = arith.constant 0 : i32
    %c0_i32_1 = arith.constant 0 : i32
    return %c0_i32, %c0_i32_0 : i32, i32
  }
  func.func @transform_5(%arg0: i32, %arg1: i32, %arg2: memref<1xi32, #tpu.memory_space<smem>>) -> (i32, i32) {
    %c0_i32 = arith.constant 0 : i32
    %c0_i32_0 = arith.constant 0 : i32
    return %arg0, %c0_i32 : i32, i32
  }
}

</mosaic_0001>

<bundles_post_ra>
// kernel: tpu_custom_call.1
= control target key start
LH: loop header
LB: loop body
LE: loop exit
PB: predicated region body
PF: predicated region fallthrough
CT: control target
= control target key end

     0   :  { %12 = vsyncpa [#allocation6], 0  ;;  %s460_s0 = inlined_call_operand.<no memory space> [shape: s32[1], index: 0, kind: input, shape index: {}]   ;;  %s461_s1 = inlined_call_operand.hbm [shape: f32[8,128], index: 1, kind: input, shape index: {}]   ;;  %s462_s2 = inlined_call_operand.hbm [shape: f32[128,128], index: 2, kind: input, shape index: {}]   ;;  %s463_s3 = inlined_call_operand.vmem [shape: f32[1,128], index: 3, kind: input, shape index: {}]   ;;  %s464_s4 = inlined_call_operand.vmem [shape: f32[1,128], index: 4, kind: input, shape index: {}]   ;;  %s465_s5 = inlined_call_operand.vmem [shape: f32[1,128], index: 5, kind: input, shape index: {}]   ;;  %s466_s6 = inlined_call_operand.hbm [shape: f32[8,128], index: 6, kind: output, shape index: {}]  }
   0x1   :  { %13 = vsyncpa [#allocation9], 0 }
   0x2   :  { %14 = vsyncpa [#allocation7], 0  ;;  %s365_s0 = smov [#allocation5]   ;;  %s366_s22 = smov [#allocation8]  }
   0x3   :  { %s21_s21 = sshll.u32 %s365_s0, 4  ;;  %s30_s23 = sshll.u32 %s366_s22, 4  ;;  %s22_s21 = int_to_ptr.vmem [resolvable:$true] %s21_s21  ;;  %s408_s23 = int_to_ptr.vmem [resolvable:$true] %s30_s23 }
   0x4   :  { %s293_s26 = scalar_lea.hbm %s461_s1, 128 }
   0x5   :  { %p294_p0 = scmp.ne.s32.totalorder %s461_s1, %s293_s26  ;;  %p297_p1 = scmp.lt.u32.totalorder %s293_s26, %s461_s1 }
   0x7   :  { %p299_p2 = pnand %p297_p1, %p294_p0 }
   0x9   :  { %302 = shalt.err (!%p299_p2)
}
   0xa   :  { %s303_s7 = scalar_lea.vmem %s22_s21, 128  ;;  %p308_p4 = scmp.lt.s32.totalorder %s22_s21, %s22_s21 }
   0xb   :  { %p304_p3 = scmp.ne.s32.totalorder %s22_s21, %s303_s7  ;;  %p309_p5 = scmp.lt.s32.totalorder %s303_s7, %s303_s7 }
   0xd   :  { %p310_p6 = por %p309_p5, %p308_p4 }
   0xf   :  { %p311_p7 = pnand %p310_p6, %p304_p3 }
  0x11   :  { %314 = shalt.err (!%p311_p7)
}
  0x12   :  { %24 = dma.hbm_to_vmem [thread:$0]  %s461_s1, 128, %s22_s21, [#allocation6]  }
  0x13   :  { %s315_s12 = scalar_lea.hbm %s462_s2, 2048 }
  0x14   :  { %p316_p8 = scmp.ne.s32.totalorder %s462_s2, %s315_s12  ;;  %p319_p9 = scmp.lt.u32.totalorder %s315_s12, %s462_s2 }
  0x16   :  { %p321_p10 = pnand %p319_p9, %p316_p8 }
  0x18   :  { %324 = shalt.err (!%p321_p10)
}
  0x19   :  { %s325_s17 = scalar_lea.vmem %s408_s23, 2048  ;;  %p330_p12 = scmp.lt.s32.totalorder %s408_s23, %s408_s23 }
  0x1a   :  { %p326_p11 = scmp.ne.s32.totalorder %s408_s23, %s325_s17  ;;  %p331_p13 = scmp.lt.s32.totalorder %s325_s17, %s325_s17 }
  0x1c   :  { %p332_p0 = por %p331_p13, %p330_p12 }
  0x1e   :  { %p333_p1 = pnand %p332_p0, %p326_p11 }
  0x20   :  { %336 = shalt.err (!%p333_p1)
}
  0x21   :  { %s367_s1 = smov 128   ;;  %s368_s18 = smov 8  }
  0x22   :  { %36 = dma.hbm_to_vmem [thread:$0]  %s462_s2, 2048, %s408_s23, [#allocation9], %s367_s1, %s367_s1, %s368_s18  }
  0x23   :  { %359 = dma.done.wait [#allocation6], 128  }
  0x24   :  { %360 = vsyncadd [#allocation6], 4294967168 }
  0x25   :  { %361 = dma.done.wait [#allocation9], 2048  }
  0x26   :  { %362 = vsyncadd [#allocation9], 4294965248  ;;  %v369_v0 = vmov 0.0|0.0   ;;  %vm370_vm0 = vmmov 0   ;;  %v371_v1 = vmov 0.0   ;;  %v55_v2 = vld [vmem:[#allocation8] sm:$0xff] }
  0x27   :  { %259 = vmatprep.subr.bf16.mxu0 %v369_v0  ;;  %256 = vmatprep.mubr.msk.f32.mxu0 %vm370_vm0, %v371_v1  ;;  %v56_v3 = vld [vmem:[#allocation8 + $0x8] sm:$0xff]  ;;  %v57_v4 = vld [vmem:[#allocation8 + $0x10] sm:$0xff]  ;;  %v58_v6 = vld [vmem:[#allocation8 + $0x18] sm:$0xff]  ;;  %s372_s24 = smov [#allocation10]  }
  0x28   :  { %v260_v5 = vpack.c.bf16 %v56_v3, %v55_v2  ;;  %v263_v7 = vpack.c.bf16 %v58_v6, %v57_v4  ;;  %v59_v8 = vld [vmem:[#allocation8 + $0x20] sm:$0xff]  ;;  %v60_v9 = vld [vmem:[#allocation8 + $0x28] sm:$0xff]  ;;  %v61_v11 = vld [vmem:[#allocation8 + $0x30] sm:$0xff]  ;;  %s194_s25 = sshll.u32 %s372_s24, 4  ;;  %s195_s25 = int_to_ptr.vmem [resolvable:$true] %s194_s25 }
  0x29   :  { %v266_v10 = vpack.c.bf16 %v60_v9, %v59_v8  ;;  %v62_v12 = vld [vmem:[#allocation8 + $0x38] sm:$0xff]  ;;  %v63_v14 = vld [vmem:[#allocation8 + $0x40] sm:$0xff]  ;;  %v64_v15 = vld [vmem:[#allocation8 + $0x48] sm:$0xff]  ;;  %s337_s26 = scalar_lea.vmem %s195_s25, 128  ;;  %p342_p3 = scmp.lt.s32.totalorder %s195_s25, %s195_s25 }
  0x2a   :  { %261 = vmatpush3.bf16.msra.mxu0 %v260_v5  ;;  %v269_v13 = vpack.c.bf16 %v62_v12, %v61_v11  ;;  %v272_v16 = vpack.c.bf16 %v64_v15, %v63_v14  ;;  %v65_v17 = vld [vmem:[#allocation8 + $0x50] sm:$0xff]  ;;  %v66_v18 = vld [vmem:[#allocation8 + $0x58] sm:$0xff]  ;;  %v67_v20 = vld [vmem:[#allocation8 + $0x60] sm:$0xff]  ;;  %p338_p2 = scmp.ne.s32.totalorder %s195_s25, %s337_s26  ;;  %p343_p4 = scmp.lt.s32.totalorder %s337_s26, %s337_s26 }
  0x2b   :  { %262 = vmatprep.subr.bf16.mxu0 %v369_v0  ;;  %v275_v19 = vpack.c.bf16 %v66_v18, %v65_v17  ;;  %v68_v21 = vld [vmem:[#allocation8 + $0x68] sm:$0xff]  ;;  %v69_v23 = vld [vmem:[#allocation8 + $0x70] sm:$0xff]  ;;  %v70_v24 = vld [vmem:[#allocation8 + $0x78] sm:$0xff] }
  0x2c   :  { %v278_v22 = vpack.c.bf16 %v68_v21, %v67_v20  ;;  %v281_v25 = vpack.c.bf16 %v70_v24, %v69_v23  ;;  %v54_v26 = vld [vmem:[#allocation5] sm:$0xff]  ;;  %p344_p5 = por %p343_p4, %p342_p3 }
  0x2d   :  { %v204_v27 = vld [vmem:[%s463_s3] ss:$0 sm:$0xff] }
  0x2e   :  { %264 = vmatpush3.bf16.msra.mxu0 %v263_v7  ;;  %v205_v43 = vld [vmem:[%s464_s4] ss:$0 sm:$0xff]  ;;  %p345_p6 = pnand %p344_p5, %p338_p2 }
  0x2f   :  { %265 = vmatprep.subr.bf16.mxu0 %v369_v0  ;;  %v206_v45 = vld [vmem:[%s465_s5] ss:$0 sm:$0xff] }
  0x32   :  { %267 = vmatpush3.bf16.msra.mxu0 %v266_v10 }
  0x33   :  { %268 = vmatprep.subr.bf16.mxu0 %v369_v0 }
  0x36   :  { %270 = vmatpush3.bf16.msra.mxu0 %v269_v13 }
  0x37   :  { %271 = vmatprep.subr.bf16.mxu0 %v369_v0 }
  0x3a   :  { %273 = vmatpush3.bf16.msra.mxu0 %v272_v16 }
  0x3b   :  { %274 = vmatprep.subr.bf16.mxu0 %v369_v0 }
  0x3e   :  { %276 = vmatpush3.bf16.msra.mxu0 %v275_v19 }
  0x3f   :  { %277 = vmatprep.subr.bf16.mxu0 %v369_v0 }
  0x42   :  { %279 = vmatpush3.bf16.msra.mxu0 %v278_v22 }
  0x43   :  { %280 = vmatprep.subr.bf16.mxu0 %v369_v0 }
  0x46   :  { %282 = vmatpush3.bf16.msra.mxu0 %v281_v25 }
  0x49   :  { %257 = vmatmul.mubr.f32.vlgmr.msra.gmra.mrb[0].mxu0 %v54_v26 }
 0x11c   :  { %v138_v28 = vpop.f32.mrb[0].mxu0 }
 0x11d   :  { %v155_v29 = vadd.f32 %v204_v27, %v138_v28  ;;  %v258_v30 = vpop.f32.mrb[1].mxu0 }
 0x11f   :  { %v156_v31 = vmax.f32 %v155_v29, 0.0 }
 0x121   :  { %157 = vadd.xlane.f32.xlu0 %v156_v31  ;;  %v159_v32 = vmul.f32 %v156_v31, %v156_v31 }
 0x125   :  { %160 = vadd.xlane.f32.xlu0 %v159_v32 }
 0x1ae   :  { %v158_v33 = vpop.xlane.xlu0 %157 }
 0x1af   :  { %v162_v34 = vmul.f32 0.015625, %v158_v33 }
 0x1b1   :  { %v164_v36 = vmul.f32 %v162_v34, %v162_v34  ;;  %v167_v41 = vsub.f32 %v156_v31, %v162_v34 }
 0x1b2   :  { %v161_v35 = vpop.xlane.xlu0 %160 }
 0x1b3   :  { %v163_v37 = vmul.f32 0.015625, %v161_v35 }
 0x1b5   :  { %v165_v38 = vsub.f32 %v163_v37, %v164_v36 }
 0x1b7   :  { %v166_v39 = vmax.f32 %v165_v38, 0.0 }
 0x1b9   :  { %v168_v40 = vadd.f32 1e-05, %v166_v39 }
 0x1bb   :  { %291 = vrsqrt.f32 %v168_v40 }
 0x1c5   :  { %v292_v42 = vpop.eup %291 }
 0x1c6   :  { %v170_v44 = vmul.f32 %v292_v42, %v167_v41 }
 0x1c8   :  { %v178_v46 = vmul.f32 %v205_v43, %v170_v44 }
 0x1ca   :  { %v186_v47 = vadd.f32 %v206_v45, %v178_v46 }
 0x1cc   :  { %187 = vst [vmem:[#allocation10] sm:$0xff] %v186_v47 }
 0x1cd   :  { %348 = shalt.err (!%p345_p6)
}
 0x1ce   :  { %s349_s28 = scalar_lea.hbm %s466_s6, 128 }
 0x1cf   :  { %p350_p7 = scmp.ne.s32.totalorder %s466_s6, %s349_s28  ;;  %p353_p8 = scmp.lt.u32.totalorder %s349_s28, %s466_s6 }
 0x1d1   :  { %p355_p9 = pnand %p353_p8, %p350_p7 }
 0x1d3   :  { %358 = shalt.err (!%p355_p9)
}
 0x1d4   :  { %197 = dma.vmem_to_hbm [thread:$0]  %s195_s25, 128, %s466_s6, [#allocation7]  }
 0x1d5   :  { %363 = dma.done.wait [#allocation7], 128  }
 0x1d6   :  { %364 = vsyncadd [#allocation7], 4294967168 }
 0x1d7   :  { %201 = vsyncpa [#allocation6], 1 }
 0x1d8   :  { %202 = vsyncpa [#allocation9], 1 }
 0x1d9   :  { %203 = vsyncpa [#allocation7], 1 }

</bundles_post_ra>
